<compile_context>
chip_gen: v6e
topology: v6e:2x2x1
jax: 0.10.0
libtpu: 0.0.40
codegen_flags: <defaults>
</compile_context>

<pallas_src>
import jax
import jax.numpy as jnp
from jax.experimental import pallas as pl
from jax.experimental.pallas import tpu as pltpu


def _nn_classifier_kernel(x_ref, wd_ref, bd_ref, o_ref):
    # d[r, j] = (partner-class logit) - (own-class logit) for output column j,
    # produced by a single matmul against the pre-differenced (block-diag) weight.
    d = jnp.dot(x_ref[...], wd_ref[...], preferred_element_type=jnp.float32)
    d = d + bd_ref[...]
    # 2-class log_softmax: logp_j = -softplus(partner_j - logit_j); stable softplus.
    o_ref[...] = -(jnp.maximum(d, 0.0) + jnp.log1p(jnp.exp(-jnp.abs(d))))


def _round8_up(n):
    return -(-n // 8) * 8


def nn_classifier_forward(x, weight_t, bias, *, max_tile_rows=4096):
    """x: [B, L] f32, weight_t: [L, 2] (= PyTorch W.T), bias: [2] -> log-probs [B, 2] f32."""
    B, L = x.shape
    C = weight_t.shape[1]
    assert C == 2, "NNClassifier has exactly 2 output classes"

    w = weight_t.astype(jnp.float32)
    b = bias.reshape(C).astype(jnp.float32)

    # Pre-differenced weight/bias: column c gets x @ (w_other - w_c) + (b_other - b_c).
    dw = w[:, 1] - w[:, 0]                                   # [L]
    wd2 = jnp.stack([dw, -dw], axis=1)                       # [L, 2]
    bd2 = jnp.stack([b[1] - b[0], b[0] - b[1]])              # [2]

    # Lane-dense packing: fold P consecutive rows into one 128-wide row when possible.
    P = 128 // L if (L <= 128 and 128 % L == 0 and B % max(1, 128 // L) == 0) else 1
    if P > 1:
        x2 = x.reshape(B // P, L * P)                        # contiguous view, no HBM copy
        wd = jnp.kron(jnp.eye(P, dtype=jnp.float32), wd2)    # [L*P, 2*P] block-diagonal
        bd = jnp.tile(bd2, P).reshape(1, 2 * P)
    else:
        x2 = x
        wd = wd2
        bd = bd2.reshape(1, 2)

    R, K = x2.shape
    N = 2 * P

    # Tile the (packed) batch rows.  Double-buffered in+out costs ~2 KiB per row
    # (both pad to 128 lanes), so TM <= 4096 stays under 8 MiB everywhere.
    if R <= max_tile_rows:
        if R >= 2048:
            TM = _round8_up(-(-R // 2))      # ~2 tiles so both v7x TensorCores get work
        else:
            TM = R                           # single tile (block == full array dim)
    else:
        TM = _round8_up(max_tile_rows)
    grid = (pl.cdiv(R, TM),)

    cost = pl.CostEstimate(
        flops=2 * R * K * N,
        transcendentals=2 * R * N,           # exp + log1p per output element
        bytes_accessed=R * K * 4 + K * N * 4 + N * 4 + R * N * 4,
    )

    out = pl.pallas_call(
        _nn_classifier_kernel,
        out_shape=jax.ShapeDtypeStruct((R, N), jnp.float32),
        grid=grid,
        in_specs=[
            pl.BlockSpec((TM, K), lambda i: (i, 0)),   # streamed batch tiles
            pl.BlockSpec((K, N), lambda i: (0, 0)),    # weight stays resident
            pl.BlockSpec((1, N), lambda i: (0, 0)),    # bias row stays resident
        ],
        out_specs=pl.BlockSpec((TM, N), lambda i: (i, 0)),
        compiler_params=pltpu.CompilerParams(
            dimension_semantics=("parallel",),         # shard batch tiles across TCs
        ),
        cost_estimate=cost,
    )(x2, wd, bd)

    return out.reshape(B, C)                 # contiguous un-packing; no HBM copy


def _reference(x, weight_t, bias):
    logits = x.astype(jnp.float32) @ weight_t.astype(jnp.float32) + bias.reshape(1, -1)
    return jax.nn.log_softmax(logits, axis=1)


if __name__ == "__main__":
    # Shapes consistent with the module: input_length=32, 2 classes.
    L, C = 32, 2
    key = jax.random.PRNGKey(0)
    kx, kw, kb, kx2, kx3 = jax.random.split(key, 5)

    # Deterministic synthetic parameters (stand-in for nn.Linear init).
    w = jax.random.normal(kw, (L, C), dtype=jnp.float32) * 0.1   # [L, 2] = W.T
    b = jax.random.normal(kb, (C,), dtype=jnp.float32) * 0.01    # [2]

    # Small batch: lane-packed path, single tile.
    B = 8
    x = jax.random.normal(kx, (B, L), dtype=jnp.float32)
    out = nn_classifier_forward(x, w, b)
    jax.block_until_ready(out)
    assert out.shape == (B, C)
    assert jnp.allclose(out, _reference(x, w, b), atol=1e-4), "mismatch (packed, single tile)"

    # Batch not divisible by 4: un-packed fallback path, single tile.
    B2 = 1030
    x2 = jax.random.normal(kx2, (B2, L), dtype=jnp.float32)
    out2 = nn_classifier_forward(x2, w, b)
    jax.block_until_ready(out2)
    assert out2.shape == (B2, C)
    assert jnp.allclose(out2, _reference(x2, w, b), atol=1e-4), "mismatch (fallback path)"

    # Larger batch: packed path, 2 tiles, ragged last block masked on store.
    B3 = 8200
    x3 = jax.random.normal(kx3, (B3, L), dtype=jnp.float32)
    out3 = nn_classifier_forward(x3, w, b)
    jax.block_until_ready(out3)
    assert out3.shape == (B3, C)
    assert jnp.allclose(out3, _reference(x3, w, b), atol=1e-4), "mismatch (tiled/ragged path)"

    print("KERNEL_OK")
</pallas_src>

<mosaic_0001>
module attributes {stable_mosaic.version = 11 : i64} {
  func.func @_nn_classifier_kernel(%arg0: i32, %arg1: memref<2x128xf32, #tpu.memory_space<vmem>>, %arg2: memref<128x8xf32, #tpu.memory_space<vmem>>, %arg3: memref<1x8xf32, #tpu.memory_space<vmem>>, %arg4: memref<2x8xf32, #tpu.memory_space<vmem>>) attributes {dimension_semantics = [#tpu.dimension_semantics<parallel>], iteration_bounds = array<i64: 1>, scalar_prefetch = 0 : i64, scratch_operands = 0 : i64, tpu.core_type = #tpu.core_type<tc>, window_params = [{transform_indices = @transform_0, window_bounds = array<i64: 2, 128>}, {pipeline_mode = #tpu.pipeline_mode<synchronous>, transform_indices = @transform_1, window_bounds = array<i64: 128, 8>}, {pipeline_mode = #tpu.pipeline_mode<synchronous>, transform_indices = @transform_2, window_bounds = array<i64: 1, 8>}, {transform_indices = @transform_3, window_bounds = array<i64: 2, 8>}]} {
    %c0 = arith.constant 0 : index
    %c0_0 = arith.constant 0 : index
    %0 = vector.load %arg1[%c0, %c0_0] : memref<2x128xf32, #tpu.memory_space<vmem>>, vector<2x128xf32>
    %c0_1 = arith.constant 0 : index
    %c0_2 = arith.constant 0 : index
    %1 = vector.load %arg2[%c0_1, %c0_2] : memref<128x8xf32, #tpu.memory_space<vmem>>, vector<128x8xf32>
    %cst = arith.constant dense<0.000000e+00> : vector<2x8xf32>
    %2 = tpu.matmul %0, %1, %cst {dimension_numbers = #tpu.dot_dimension_numbers<[1], [0], [0], [1], [0, 0, 1, 1], [], []>} : vector<2x128xf32>, vector<128x8xf32>, vector<2x8xf32> -> vector<2x8xf32>
    %c0_3 = arith.constant 0 : index
    %c0_4 = arith.constant 0 : index
    %3 = vector.load %arg3[%c0_3, %c0_4] : memref<1x8xf32, #tpu.memory_space<vmem>>, vector<1x8xf32>
    %4 = vector.broadcast %3 : vector<1x8xf32> to vector<2x8xf32>
    %5 = arith.addf %2, %4 : vector<2x8xf32>
    %cst_5 = arith.constant 0.000000e+00 : f32
    %6 = vector.broadcast %cst_5 : f32 to vector<2x8xf32>
    %7 = arith.maximumf %5, %6 : vector<2x8xf32>
    %8 = math.absf %5 : vector<2x8xf32>
    %cst_6 = arith.constant 0.000000e+00 : f32
    %9 = vector.broadcast %cst_6 : f32 to vector<2x8xf32>
    %10 = arith.subf %9, %8 : vector<2x8xf32>
    %11 = math.exp %10 : vector<2x8xf32>
    %12 = math.log1p %11 : vector<2x8xf32>
    %13 = arith.addf %7, %12 : vector<2x8xf32>
    %cst_7 = arith.constant 0.000000e+00 : f32
    %14 = vector.broadcast %cst_7 : f32 to vector<2x8xf32>
    %15 = arith.subf %14, %13 : vector<2x8xf32>
    %c0_8 = arith.constant 0 : index
    %c0_9 = arith.constant 0 : index
    %16 = vector.load %arg4[%c0_8, %c0_9] : memref<2x8xf32, #tpu.memory_space<vmem>>, vector<2x8xf32>
    tpu.vector_store %arg4[%c0_8, %c0_9], %15 {strides = array<i32>} : memref<2x8xf32, #tpu.memory_space<vmem>>, vector<2x8xf32>,
    return
  }
  func.func @transform_0(%arg0: i32) -> (i32, i32) {
    %c0_i32 = arith.constant 0 : i32
    %c0_i32_0 = arith.constant 0 : i32
    return %arg0, %c0_i32 : i32, i32
  }
  func.func @transform_1(%arg0: i32) -> (i32, i32) {
    %c0_i32 = arith.constant 0 : i32
    %c0_i32_0 = arith.constant 0 : i32
    %c0_i32_1 = arith.constant 0 : i32
    return %c0_i32, %c0_i32_0 : i32, i32
  }
  func.func @transform_2(%arg0: i32) -> (i32, i32) {
    %c0_i32 = arith.constant 0 : i32
    %c0_i32_0 = arith.constant 0 : i32
    %c0_i32_1 = arith.constant 0 : i32
    return %c0_i32, %c0_i32_0 : i32, i32
  }
  func.func @transform_3(%arg0: i32) -> (i32, i32) {
    %c0_i32 = arith.constant 0 : i32
    %c0_i32_0 = arith.constant 0 : i32
    return %arg0, %c0_i32 : i32, i32
  }
}

</mosaic_0001>

<bundles_post_ra>
// kernel: tpu_custom_call.1
= control target key start
LH: loop header
LB: loop body
LE: loop exit
PB: predicated region body
PF: predicated region fallthrough
CT: control target
= control target key end

     0   :  { %v223_v1 = vmov 0.0   ;;  %vm224_vm0 = vmmov 0   ;;  %s303_s0 = inlined_call_operand.vmem [shape: f32[2,128], index: 0, kind: input, shape index: {}]   ;;  %s304_s1 = inlined_call_operand.vmem [shape: f32[128,8], index: 1, kind: input, shape index: {}]   ;;  %s305_s2 = inlined_call_operand.vmem [shape: f32[1,8], index: 2, kind: input, shape index: {}]   ;;  %s306_s3 = inlined_call_operand.hbm [shape: f32[2,8], index: 3, kind: output, shape index: {}]  }
   0x1   :  { %v31_v0 = vld [vmem:[%s304_s1 + $0x78] sm:$0xff]  ;;  %159 = vmatprep.subr.mxu0 %v223_v1  ;;  %v30_v2 = vld [vmem:[%s304_s1 + $0x70] sm:$0xff]  ;;  %191 = vmatprep.mubr.msk.f32.mxu0 %vm224_vm0, %v223_v1  ;;  %v29_v3 = vld [vmem:[%s304_s1 + $0x68] sm:$0xff] }
   0x2   :  { %160 = vmatpush3.msra.mxu0 %v31_v0  ;;  %v28_v4 = vld [vmem:[%s304_s1 + $0x60] sm:$0xff] }
   0x3   :  { %161 = vmatprep.subr.mxu0 %v223_v1 }
   0x4   :  { %162 = vmatpush3.msra.mxu0 %v30_v2 }
   0x5   :  { %163 = vmatprep.subr.mxu0 %v223_v1 }
   0x6   :  { %164 = vmatpush3.msra.mxu0 %v29_v3 }
   0x7   :  { %8 = vsyncpa [#allocation3], 0  ;;  %165 = vmatprep.subr.mxu0 %v223_v1  ;;  %v27_v5 = vld [vmem:[%s304_s1 + $0x58] sm:$0xff]  ;;  %v26_v6 = vld [vmem:[%s304_s1 + $0x50] sm:$0xff]  ;;  %vm125_vm2 = vcmask 58368  }
   0x8   :  { %166 = vmatpush3.msra.mxu0 %v28_v4  ;;  %v25_v7 = vld [vmem:[%s304_s1 + $0x48] sm:$0xff]  ;;  %v24_v8 = vld [vmem:[%s304_s1 + $0x40] sm:$0xff]  ;;  %v23_v9 = vld [vmem:[%s304_s1 + $0x38] sm:$0xff] }
   0x9   :  { %167 = vmatprep.subr.mxu0 %v223_v1  ;;  %v22_v10 = vld [vmem:[%s304_s1 + $0x30] sm:$0xff]  ;;  %v21_v11 = vld [vmem:[%s304_s1 + $0x28] sm:$0xff]  ;;  %v20_v12 = vld [vmem:[%s304_s1 + $0x20] sm:$0xff] }
   0xa   :  { %168 = vmatpush3.msra.mxu0 %v27_v5  ;;  %v19_v13 = vld [vmem:[%s304_s1 + $0x18] sm:$0xff]  ;;  %v18_v14 = vld [vmem:[%s304_s1 + $0x10] sm:$0xff]  ;;  %v17_v15 = vld [vmem:[%s304_s1 + $0x8] sm:$0xff] }
   0xb   :  { %169 = vmatprep.subr.mxu0 %v223_v1  ;;  %v16_v16 = vld [vmem:[%s304_s1] sm:$0xff] }
   0xc   :  { %170 = vmatpush3.msra.mxu0 %v26_v6  ;;  %v15_v17 = vld [vmem:[%s303_s0] sm:$0x3]  ;;  %s225_s0 = smov [#allocation2]  }
   0xd   :  { %171 = vmatprep.subr.mxu0 %v223_v1  ;;  %v141_v18 = vld [vmem:[%s305_s2] ss:$0 sm:$0xff]  ;;  %s133_s1 = sshll.u32 %s225_s0, 4  ;;  %s134_s1 = int_to_ptr.vmem [resolvable:$true] %s133_s1 }
   0xe   :  { %172 = vmatpush3.msra.mxu0 %v25_v7  ;;  %s201_s2 = scalar_lea.vmem %s134_s1, 32  ;;  %p206_p1 = scmp.lt.s32.totalorder %s134_s1, %s134_s1 }
   0xf   :  { %173 = vmatprep.subr.mxu0 %v223_v1  ;;  %p202_p0 = scmp.ne.s32.totalorder %s134_s1, %s201_s2  ;;  %p207_p2 = scmp.lt.s32.totalorder %s201_s2, %s201_s2 }
  0x10   :  { %174 = vmatpush3.msra.mxu0 %v24_v8 }
  0x11   :  { %175 = vmatprep.subr.mxu0 %v223_v1  ;;  %p208_p3 = por %p207_p2, %p206_p1 }
  0x12   :  { %176 = vmatpush3.msra.mxu0 %v23_v9 }
  0x13   :  { %177 = vmatprep.subr.mxu0 %v223_v1  ;;  %p209_p4 = pnand %p208_p3, %p202_p0 }
  0x14   :  { %178 = vmatpush3.msra.mxu0 %v22_v10 }
  0x15   :  { %179 = vmatprep.subr.mxu0 %v223_v1 }
  0x16   :  { %180 = vmatpush3.msra.mxu0 %v21_v11 }
  0x17   :  { %181 = vmatprep.subr.mxu0 %v223_v1 }
  0x18   :  { %182 = vmatpush3.msra.mxu0 %v20_v12 }
  0x19   :  { %183 = vmatprep.subr.mxu0 %v223_v1 }
  0x1a   :  { %184 = vmatpush3.msra.mxu0 %v19_v13 }
  0x1b   :  { %185 = vmatprep.subr.mxu0 %v223_v1 }
  0x1c   :  { %186 = vmatpush3.msra.mxu0 %v18_v14 }
  0x1d   :  { %187 = vmatprep.subr.mxu0 %v223_v1 }
  0x1e   :  { %188 = vmatpush3.msra.mxu0 %v17_v15 }
  0x1f   :  { %189 = vmatprep.subr.mxu0 %v223_v1 }
  0x20   :  { %190 = vmatpush3.msra.mxu0 %v16_v16 }
  0x21   :  { %192 = vmatmul.mubr.f32.vlgmr.msra.gmra.mxu0 %v15_v17 }
  0xe1   :  { %v105_v19 = vpop.f32.mrf.mxu0 }
  0xe2   :  { %v106_v20 = vadd.f32 %v141_v18, %v105_v19 }
  0xe3   :  { %v193_v21 = vpop.f32.mrf.mxu0 }
  0xe4   :  { %v110_v22 = vand.u32 2147483647, %v106_v20  ;;  %v109_v33 = vmax.f32 %v106_v20, 0.0 }
  0xe6   :  { %v111_v23 = vsub.f32 0.0, %v110_v22 }
  0xe8   :  { %v112_v24 = vmul.f32 1.442695, %v111_v23 }
  0xea   :  { %197 = vpow2.f32 %v112_v24 }
  0xf7   :  { %v198_v25 = vpop.eup %197 }
  0xf8   :  { %v114_v26 = vadd.f32 1.0, %v198_v25  ;;  %v117_v27 = vmul.f32 -0.5, %v198_v25  ;;  %v120_v29 = vand.u32 2147483647, %v198_v25 }
  0xfa   :  { %199 = vlog2.f32 %v114_v26  ;;  %v118_v28 = vadd.f32 1.0, %v117_v27  ;;  %vm121_vm1 = vcmp.lt.f32.partialorder %v120_v29, 0.0004427343 }
  0xfc   :  { %v119_v32 = vmul.f32 %v198_v25, %v118_v28 }
 0x107   :  { %v200_v30 = vpop.eup %199 }
 0x108   :  { %v116_v31 = vmul.f32 0.6931472, %v200_v30 }
 0x10a   :  { %v122_v34 = vsel %vm121_vm1, %v119_v32, %v116_v31 }
 0x10b   :  { %v123_v35 = vadd.f32 %v122_v34, %v109_v33 }
 0x10d   :  { %v124_v36 = vsub.f32 0.0, %v123_v35 }
 0x10f   :  { %126 = vst.msk [vmem:[#allocation2] sm:$0x3] %vm125_vm2, %v124_v36 }
 0x110   :  { %212 = shalt.err (!%p209_p4)
}
 0x111   :  { %136 = dma.vmem_to_hbm [thread:$0]  %s134_s1, 32, %s306_s3, [#allocation3]  }
 0x112   :  { %221 = dma.done.wait [#allocation3], 32  }
 0x113   :  { %222 = vsyncadd [#allocation3], 4294967264 }
 0x114   :  { %140 = vsyncpa [#allocation3], 1 }

</bundles_post_ra>
